<compile_context>
chip_gen: v7x
topology: tpu7x:2x2x1
jax: 0.10.0
libtpu: 0.0.40
codegen_flags: <defaults>
</compile_context>

<pallas_src>
import functools

import jax
import jax.numpy as jnp
from jax.experimental import pallas as pl
from jax.experimental.pallas import tpu as pltpu


_LANE_CHUNK = 2048  # class-axis chunk width processed per inner step


def _ls_ce_kernel(x_ref, tgt_ref, out_ref, *, smoothing):
    """One row tile.

    x_ref:   (TM, C)   logits (f32 or bf16), VMEM
    tgt_ref: (TM, 1)   int32 class indices, VMEM
    out_ref: (TM, 128) f32; per-row loss broadcast across lanes (lane-dense store)
    """
    confidence = 1.0 - smoothing
    tm, c = x_ref.shape
    ck = min(c, _LANE_CHUNK)

    tgt = tgt_ref[...]  # (TM, 1) int32
    # NOTE: out-of-range / negative targets silently contribute gathered=0
    # (PyTorch's NLLLoss would raise); clamp or pl.debug_check here if needed.

    # Pass 1: row max for numerical stability (chunked over the class axis; the
    # tile is VMEM-resident, so re-reading it in pass 2 is cheap vld traffic).
    m = jnp.full((tm, 1), -jnp.inf, dtype=jnp.float32)
    for s in range(0, c, ck):
        w = min(ck, c - s)
        xk = x_ref[:, s:s + w].astype(jnp.float32)               # (TM, w)
        m = jnp.maximum(m, jnp.max(xk, axis=-1, keepdims=True))

    # Pass 2: chunked VALU/XLU reductions (no MXU involvement at all).
    sum_e = jnp.zeros((tm, 1), jnp.float32)      # sum exp(x - m)
    sum_x = jnp.zeros((tm, 1), jnp.float32)      # sum x
    gathered = jnp.zeros((tm, 1), jnp.float32)   # x[n, target[n]]
    for s in range(0, c, ck):
        w = min(ck, c - s)
        xk = x_ref[:, s:s + w].astype(jnp.float32)               # (TM, w)
        # One-hot from a (1, w) iota broadcast against (TM, 1) targets.
        col = jax.lax.broadcasted_iota(jnp.int32, (1, w), 1) + s
        onehot = col == tgt                                       # (TM, w) bool
        sum_e = sum_e + jnp.sum(jnp.exp(xk - m), axis=-1, keepdims=True)
        sum_x = sum_x + jnp.sum(xk, axis=-1, keepdims=True)
        gathered = gathered + jnp.sum(jnp.where(onehot, xk, 0.0),
                                      axis=-1, keepdims=True)

    lse = m + jnp.log(sum_e)                     # (TM, 1)
    nll_loss = lse - gathered
    smooth_loss = lse - sum_x * (1.0 / c)
    loss = confidence * nll_loss + smoothing * smooth_loss

    # Lane-dense store: broadcast the per-row scalar across 128 lanes.
    out_ref[...] = jnp.broadcast_to(loss, (tm, 128)).astype(out_ref.dtype)


def _vmem_capacity_bytes():
    # v7x has 64 MiB per TensorCore, v5e/v6e 128 MiB; fall back to the smaller.
    try:
        info = pltpu.get_tpu_info()
        return int(getattr(info, "vmem_capacity_bytes", 64 * 1024 * 1024))
    except Exception:
        return 64 * 1024 * 1024


def _per_row_vmem_bytes(c, itemsize):
    ck = min(c, _LANE_CHUNK)
    # double-buffered x tile + ~4 f32 (TM, chunk) temporaries
    # + double-buffered (TM, 128) f32 output block + (TM, 1) int32 target block.
    return 2 * c * itemsize + 4 * ck * 4 + 2 * 128 * 4 + 2 * 4


def _choose_row_tile(n, c, itemsize, budget_bytes, block_rows=None):
    sub = {4: 8, 2: 16, 1: 32}.get(itemsize, 8)      # sublane packing granule
    if block_rows is not None:
        tm = int(block_rows)
    else:
        tm = max(1, budget_bytes // _per_row_vmem_bytes(c, itemsize))
        tm = min(tm, 1024)                            # diminishing returns past ~1024 rows
        # Keep >= ~8 grid steps on large N (v7x: 2 TCs + pipeline overlap), but
        # never shrink tiles below 128 rows for that reason alone.
        tm = min(tm, max(128, pl.cdiv(n, 8)))
    tm = min(tm, n)
    if tm >= n:
        return n                                      # single full-extent tile (always legal)
    if tm >= 128:
        return (tm // 128) * 128                      # lane-dense out block, any dtype granule
    return max(sub, (tm // sub) * sub)


def label_smoothing_cross_entropy(x, target, smoothing=0.1, reduction=None,
                                  block_rows=None):
    """x: (N, C) f32/bf16 logits; target: (N,) integer class indices."""
    n, c = x.shape
    tgt2d = target.astype(jnp.int32).reshape(n, 1)
    itemsize = jnp.dtype(x.dtype).itemsize

    vmem_cap = _vmem_capacity_bytes()
    budget = int(0.45 * vmem_cap)                 # per-tile footprint target (fits v7x 64 MiB)
    tm = _choose_row_tile(n, c, itemsize, budget, block_rows)
    num_tiles = pl.cdiv(n, tm)

    footprint = _per_row_vmem_bytes(c, itemsize) * tm
    vmem_limit = int(min(int(0.85 * vmem_cap),
                         max(32 * 1024 * 1024, footprint + 16 * 1024 * 1024)))

    kernel = functools.partial(_ls_ce_kernel, smoothing=float(smoothing))

    out = pl.pallas_call(
        kernel,
        out_shape=jax.ShapeDtypeStruct((num_tiles * tm, 128), jnp.float32),
        grid=(num_tiles,),
        in_specs=[
            pl.BlockSpec((tm, c), lambda i: (i, 0)),   # logits row tile
            pl.BlockSpec((tm, 1), lambda i: (i, 0)),   # targets row tile
        ],
        out_specs=pl.BlockSpec((tm, 128), lambda i: (i, 0)),
        compiler_params=pltpu.CompilerParams(
            dimension_semantics=("parallel",),
            vmem_limit_bytes=vmem_limit,
        ),
    )(x, tgt2d)

    # Column 0 holds the loss; rows of the padded last tile hold garbage.
    loss = out[:n, 0]

    if reduction is None:
        return loss
    elif reduction == "sum":
        return loss.sum()
    elif reduction == "mean":
        return loss.mean()
    else:
        raise ValueError(f"unknown reduction: {reduction}")


def _reference(x, target, smoothing=0.1):
    confidence = 1.0 - smoothing
    logprobs = jax.nn.log_softmax(x.astype(jnp.float32), axis=-1)
    nll = -jnp.take_along_axis(logprobs, target[:, None].astype(jnp.int32), axis=-1)[:, 0]
    smooth = -logprobs.mean(axis=-1)
    return confidence * nll + smoothing * smooth


if __name__ == "__main__":
    key = jax.random.PRNGKey(0)
    kx, kt = jax.random.split(key)

    # Case 1: single-tile path, f32 logits.  N=8 samples, C=128 classes.
    N, C = 8, 128
    x = jax.random.normal(kx, (N, C), dtype=jnp.float32)
    target = jax.random.randint(kt, (N,), 0, C, dtype=jnp.int32)

    loss = label_smoothing_cross_entropy(x, target, smoothing=0.1, reduction=None)
    jax.block_until_ready(loss)
    ref = _reference(x, target, smoothing=0.1)
    assert loss.shape == (N,)
    assert jnp.allclose(loss, ref, atol=1e-4, rtol=1e-4)

    # Wrapper-side 'sum' / 'mean' reductions (padded rows already sliced away).
    s = label_smoothing_cross_entropy(x, target, smoothing=0.1, reduction="sum")
    m = label_smoothing_cross_entropy(x, target, smoothing=0.1, reduction="mean")
    jax.block_until_ready((s, m))
    assert jnp.allclose(s, ref.sum(), atol=1e-3, rtol=1e-4)
    assert jnp.allclose(m, ref.mean(), atol=1e-4, rtol=1e-4)

    # Case 2: multi-step grid with a partial last tile and bf16 logits from HBM
    # (block_rows=16 forces 2 grid steps at this small demo size).
    N2, C2 = 20, 256
    x2 = jax.random.normal(kx, (N2, C2), dtype=jnp.float32).astype(jnp.bfloat16)
    t2 = jax.random.randint(kt, (N2,), 0, C2, dtype=jnp.int32)
    loss2 = label_smoothing_cross_entropy(x2, t2, smoothing=0.1, reduction=None,
                                          block_rows=16)
    jax.block_until_ready(loss2)
    ref2 = _reference(x2.astype(jnp.float32), t2, smoothing=0.1)
    assert loss2.shape == (N2,)
    assert jnp.allclose(loss2, ref2, atol=2e-3, rtol=2e-3)

    print("KERNEL_OK")
</pallas_src>

<mosaic_0001>
module attributes {stable_mosaic.version = 11 : i64} {
  func.func @_ls_ce_kernel(%arg0: i32, %arg1: memref<8x128xf32, #tpu.memory_space<vmem>>, %arg2: memref<8x1xi32, #tpu.memory_space<vmem>>, %arg3: memref<8x128xf32, #tpu.memory_space<vmem>>) attributes {dimension_semantics = [#tpu.dimension_semantics<parallel>], iteration_bounds = array<i64: 1>, scalar_prefetch = 0 : i64, scratch_operands = 0 : i64, tpu.core_type = #tpu.core_type<tc>, window_params = [{transform_indices = @transform_0, window_bounds = array<i64: 8, 128>}, {transform_indices = @transform_1, window_bounds = array<i64: 8, 1>}, {transform_indices = @transform_2, window_bounds = array<i64: 8, 128>}]} {
    %c0 = arith.constant 0 : index
    %c0_0 = arith.constant 0 : index
    %0 = vector.load %arg2[%c0, %c0_0] : memref<8x1xi32, #tpu.memory_space<vmem>>, vector<8x1xi32>
    %cst = arith.constant 0xFF800000 : f32
    %1 = vector.broadcast %cst : f32 to vector<8x1xf32>
    %c0_1 = arith.constant 0 : index
    %c0_2 = arith.constant 0 : index
    %2 = vector.load %arg1[%c0_1, %c0_2] : memref<8x128xf32, #tpu.memory_space<vmem>>, vector<8x128xf32>
    %cst_3 = arith.constant dense<0xFF800000> : vector<8xf32>
    %3 = vector.multi_reduction <maximumf>, %2, %cst_3 [1] : vector<8x128xf32> to vector<8xf32>
    %4 = vector.shape_cast %3 : vector<8xf32> to vector<8x1xf32>
    %5 = arith.maximumf %1, %4 : vector<8x1xf32>
    %cst_4 = arith.constant 0.000000e+00 : f32
    %6 = vector.broadcast %cst_4 : f32 to vector<8x1xf32>
    %cst_5 = arith.constant 0.000000e+00 : f32
    %7 = vector.broadcast %cst_5 : f32 to vector<8x1xf32>
    %cst_6 = arith.constant 0.000000e+00 : f32
    %8 = vector.broadcast %cst_6 : f32 to vector<8x1xf32>
    %c0_7 = arith.constant 0 : index
    %c0_8 = arith.constant 0 : index
    %9 = vector.load %arg1[%c0_7, %c0_8] : memref<8x128xf32, #tpu.memory_space<vmem>>, vector<8x128xf32>
    %10 = tpu.iota {dimensions = array<i32: 1>} : vector<1x128xi32>
    %c0_i32 = arith.constant 0 : i32
    %11 = vector.broadcast %c0_i32 : i32 to vector<1x128xi32>
    %12 = arith.addi %10, %11 : vector<1x128xi32>
    %13 = vector.broadcast %12 : vector<1x128xi32> to vector<8x128xi32>
    %14 = vector.broadcast %0 : vector<8x1xi32> to vector<8x128xi32>
    %15 = arith.cmpi eq, %13, %14 : vector<8x128xi32>
    %16 = vector.broadcast %5 : vector<8x1xf32> to vector<8x128xf32>
    %17 = arith.subf %9, %16 : vector<8x128xf32>
    %18 = math.exp %17 : vector<8x128xf32>
    %cst_9 = arith.constant dense<0.000000e+00> : vector<8xf32>
    %19 = vector.multi_reduction <add>, %18, %cst_9 [1] : vector<8x128xf32> to vector<8xf32>
    %20 = vector.shape_cast %19 : vector<8xf32> to vector<8x1xf32>
    %21 = arith.addf %6, %20 : vector<8x1xf32>
    %cst_10 = arith.constant dense<0.000000e+00> : vector<8xf32>
    %22 = vector.multi_reduction <add>, %9, %cst_10 [1] : vector<8x128xf32> to vector<8xf32>
    %23 = vector.shape_cast %22 : vector<8xf32> to vector<8x1xf32>
    %24 = arith.addf %7, %23 : vector<8x1xf32>
    %cst_11 = arith.constant 0.000000e+00 : f32
    %25 = vector.broadcast %cst_11 : f32 to vector<8x128xf32>
    %26 = arith.select %15, %9, %25 : vector<8x128xi1>, vector<8x128xf32>
    %cst_12 = arith.constant dense<0.000000e+00> : vector<8xf32>
    %27 = vector.multi_reduction <add>, %26, %cst_12 [1] : vector<8x128xf32> to vector<8xf32>
    %28 = vector.shape_cast %27 : vector<8xf32> to vector<8x1xf32>
    %29 = arith.addf %8, %28 : vector<8x1xf32>
    %30 = math.log %21 : vector<8x1xf32>
    %31 = arith.addf %5, %30 : vector<8x1xf32>
    %32 = arith.subf %31, %29 : vector<8x1xf32>
    %cst_13 = arith.constant 7.812500e-03 : f32
    %33 = vector.broadcast %cst_13 : f32 to vector<8x1xf32>
    %34 = arith.mulf %24, %33 : vector<8x1xf32>
    %35 = arith.subf %31, %34 : vector<8x1xf32>
    %cst_14 = arith.constant 0.899999976 : f32
    %36 = vector.broadcast %cst_14 : f32 to vector<8x1xf32>
    %37 = arith.mulf %36, %32 : vector<8x1xf32>
    %cst_15 = arith.constant 1.000000e-01 : f32
    %38 = vector.broadcast %cst_15 : f32 to vector<8x1xf32>
    %39 = arith.mulf %38, %35 : vector<8x1xf32>
    %40 = arith.addf %37, %39 : vector<8x1xf32>
    %41 = vector.shape_cast %40 : vector<8x1xf32> to vector<8x1xf32>
    %42 = vector.broadcast %41 : vector<8x1xf32> to vector<8x128xf32>
    %c0_16 = arith.constant 0 : index
    %c0_17 = arith.constant 0 : index
    %43 = vector.load %arg3[%c0_16, %c0_17] : memref<8x128xf32, #tpu.memory_space<vmem>>, vector<8x128xf32>
    tpu.vector_store %arg3[%c0_16, %c0_17], %42 {strides = array<i32>} : memref<8x128xf32, #tpu.memory_space<vmem>>, vector<8x128xf32>,
    return
  }
  func.func @transform_0(%arg0: i32) -> (i32, i32) {
    %c0_i32 = arith.constant 0 : i32
    %c0_i32_0 = arith.constant 0 : i32
    return %arg0, %c0_i32 : i32, i32
  }
  func.func @transform_1(%arg0: i32) -> (i32, i32) {
    %c0_i32 = arith.constant 0 : i32
    %c0_i32_0 = arith.constant 0 : i32
    return %arg0, %c0_i32 : i32, i32
  }
  func.func @transform_2(%arg0: i32) -> (i32, i32) {
    %c0_i32 = arith.constant 0 : i32
    %c0_i32_0 = arith.constant 0 : i32
    return %arg0, %c0_i32 : i32, i32
  }
}

</mosaic_0001>

<bundles_post_ra>
// kernel: tpu_custom_call.1
= control target key start
LH: loop header
LB: loop body
LE: loop exit
PB: predicated region body
PF: predicated region fallthrough
CT: control target
= control target key end

     0   :  { %s125_s0 = inlined_call_operand.vmem [shape: f32[8,128], index: 0, kind: input, shape index: {}]   ;;  %s126_s1 = inlined_call_operand.vmem [shape: s32[8,1], index: 1, kind: input, shape index: {}]   ;;  %s127_s2 = inlined_call_operand.hbm [shape: f32[8,128], index: 2, kind: output, shape index: {}]  }
   0x1   :  { %v13_v0 = vld [vmem:[%s125_s0] sm:$0xff] }
   0x2   :  { %7 = vsyncpa [#allocation3], 0  ;;  %14 = vmax.xlane.f32.xlu0 %v13_v0  ;;  %v90_v1 = vmov 0   ;;  %v12_v2 = vld [vmem:[%s126_s1] sm:$0xff]  ;;  %v16_v6 = vlaneseq  ;;  %s91_s0 = smov [#allocation2]  }
   0x3   :  { %61 = vset.pattern.permute.xlu0 %v90_v1  ;;  %s51_s1 = sshll.u32 %s91_s0, 4  ;;  %s52_s1 = int_to_ptr.vmem [resolvable:$true] %s51_s1 }
   0x4   :  { %v17_v7 = vand.u32 127, %v16_v6  ;;  %s66_s13 = scalar_lea.vmem %s52_s1, 128  ;;  %p71_p1 = scmp.lt.s32.totalorder %s52_s1, %s52_s1 }
   0x5   :  { %p67_p0 = scmp.ne.s32.totalorder %s52_s1, %s66_s13  ;;  %p72_p2 = scmp.lt.s32.totalorder %s66_s13, %s66_s13 }
   0x7   :  { %p73_p3 = por %p72_p2, %p71_p1 }
   0x9   :  { %p74_p4 = pnand %p73_p3, %p67_p0 }
  0x18   :  { %19 = vperm.xlu0 %61, %v12_v2  }
  0x8f   :  { %v15_v3 = vpop.xlane.xlu0 %14 }
  0x90   :  { %v22_v4 = vsub.f32 %v13_v0, %v15_v3 }
  0x92   :  { %v23_v5 = vmul.f32 1.442695, %v22_v4 }
  0x94   :  { %62 = vpow2.f32 %v23_v5 }
  0x97   :  { %v20_v9 = vpop.permute.xlu0 %19 }
  0x98   :  { %vm21_vm0 = vcmp.eq.s32.totalorder %v17_v7, %v20_v9 }
  0x99   :  { %v31_v10 = vsel %vm21_vm0, %v13_v0, 0.0 }
  0x9e   :  { %v63_v8 = vpop.eup %62 }
  0x9f   :  { %25 = vadd.xlane.f32.xlu1 %v63_v8 }
  0xa3   :  { %28 = vadd.xlane.f32.xlu1 %v13_v0 }
  0xa7   :  { %32 = vadd.xlane.f32.xlu1 %v31_v10 }
 0x12c   :  { %v26_v11 = vpop.xlane.xlu1 %25 }
 0x12d   :  { %64 = vlog2.f32 %v26_v11 }
 0x130   :  { %v29_v12 = vpop.xlane.xlu1 %28 }
 0x131   :  { %v39_v17 = vmul.f32 0.0078125, %v29_v12 }
 0x134   :  { %v33_v15 = vpop.xlane.xlu1 %32 }
 0x137   :  { %v65_v13 = vpop.eup %64 }
 0x138   :  { %v36_v14 = vmul.f32 0.6931472, %v65_v13 }
 0x13a   :  { %v37_v16 = vadd.f32 %v36_v14, %v15_v3 }
 0x13c   :  { %v40_v18 = vsub.f32 %v37_v16, %v39_v17  ;;  %v38_v19 = vsub.f32 %v37_v16, %v33_v15 }
 0x13e   :  { %v42_v20 = vmul.f32 0.1, %v40_v18  ;;  %v41_v21 = vmul.f32 0.9, %v38_v19 }
 0x140   :  { %v43_v22 = vadd.f32 %v42_v20, %v41_v21 }
 0x142   :  { %44 = vst [vmem:[#allocation2] sm:$0xff] %v43_v22 }
 0x143   :  { %77 = shalt.err (!%p74_p4)
}
 0x144   :  { %s78_s16 = scalar_lea.hbm %s127_s2, 128 }
 0x145   :  { %p79_p5 = scmp.ne.s32.totalorder %s127_s2, %s78_s16  ;;  %p82_p6 = scmp.lt.u32.totalorder %s78_s16, %s127_s2 }
 0x147   :  { %p84_p7 = pnand %p82_p6, %p79_p5 }
 0x149   :  { %87 = shalt.err (!%p84_p7)
}
 0x14a   :  { %54 = dma.vmem_to_hbm [thread:$0]  %s52_s1, 128, %s127_s2, [#allocation3]  }
 0x14b   :  { %88 = dma.done.wait [#allocation3], 128  }
 0x14c   :  { %89 = vsyncadd [#allocation3], 4294967168 }
 0x14d   :  { %58 = vsyncpa [#allocation3], 1 }

</bundles_post_ra>
